<compile_context>
chip_gen: v6e
topology: v6e:2x2x1
jax: 0.10.0
libtpu: 0.0.40
codegen_flags: <defaults>
</compile_context>

<pallas_src>
import functools

import jax
import jax.numpy as jnp
from jax import lax
from jax.experimental import pallas as pl
from jax.experimental.pallas import tpu as pltpu

LANE = 128          # TPU lane width
MAX_TILE_B = 2048   # lane-axis batch tile (multiple of 128, amortizes step overhead)


def dummy_model_kernel(x_ref, w_ref, b_ref, logits_ref, colsum_ref, *, valid_batch):
    """One batch tile of Linear(4, 2) plus per-lane loss partials.

    x_ref:      (IN,  TILE_B) f32 VMEM  -- batch on the lane axis (feature-major)
    w_ref:      (OUT*IN,)     f32 SMEM  -- row-major PyTorch weight [out, in]
    b_ref:      (OUT,)        f32 SMEM
    logits_ref: (OUT, TILE_B) f32 VMEM  -- lane-dense (TILE_B multiple of 128)
    colsum_ref: (1,   TILE_B) f32 VMEM  -- sum over OUT rows per lane; padded lanes zeroed
    """
    in_features = x_ref.shape[0]        # 4
    out_features = logits_ref.shape[0]  # 2
    tile_b = x_ref.shape[1]

    colsum = jnp.zeros((1, tile_b), jnp.float32)
    # Tiny static loops -> fully unrolled: OUT*IN VPU FMAs, no MXU dispatch.
    for o in range(out_features):
        acc = x_ref[pl.ds(0, 1), :] * w_ref[o * in_features + 0]
        for k in range(1, in_features):
            acc = acc + x_ref[pl.ds(k, 1), :] * w_ref[o * in_features + k]
        acc = acc + b_ref[o]                 # SMEM scalar broadcast-add
        logits_ref[pl.ds(o, 1), :] = acc     # unmasked lane-dense store
        colsum = colsum + acc

    # Zero loss partials for lanes past the true batch (zero-padded tail would
    # otherwise contribute bias values to the mean).
    tile_start = pl.program_id(0) * tile_b
    lane = lax.broadcasted_iota(jnp.int32, (1, tile_b), 1)
    valid = (tile_start + lane) < valid_batch
    colsum_ref[...] = jnp.where(valid, colsum, 0.0)


@jax.jit
def dummy_model_forward(x, weight, bias):
    """x: (B, 4) f32, weight: (2, 4) f32, bias: (2,) f32 -> (logits (B, 2), loss)."""
    B, in_f = x.shape
    out_f = weight.shape[0]

    # Pad the batch to a multiple of 128 lanes, pick a lane-axis tile, and make
    # the padded batch a multiple of the tile.
    b_pad = -(-B // LANE) * LANE
    tile_b = min(b_pad, MAX_TILE_B)
    b_pad = -(-b_pad // tile_b) * tile_b
    num_tiles = b_pad // tile_b

    # Layout plumbing, fused inside this single jitted program.
    # TODO(synk): in a real pipeline the producer should hand x over feature-major
    # (IN, B) and the consumer accept (OUT, B) logits, removing both transposes.
    x_t = jnp.zeros((in_f, b_pad), jnp.float32).at[:, :B].set(jnp.transpose(x))
    w_flat = weight.reshape(-1).astype(jnp.float32)   # (OUT*IN,) row-major
    b_vec = bias.astype(jnp.float32)

    logits_pad, colsum = pl.pallas_call(
        functools.partial(dummy_model_kernel, valid_batch=B),
        grid=(num_tiles,),
        out_shape=(
            jax.ShapeDtypeStruct((out_f, b_pad), jnp.float32),  # logits (OUT, B_pad)
            jax.ShapeDtypeStruct((1, b_pad), jnp.float32),      # per-lane loss partials
        ),
        in_specs=[
            pl.BlockSpec((in_f, tile_b), lambda i: (0, i)),               # x tile (VMEM)
            pl.BlockSpec(memory_space=pltpu.MemorySpace.SMEM),            # flat weight
            pl.BlockSpec(memory_space=pltpu.MemorySpace.SMEM),            # bias
        ],
        out_specs=(
            pl.BlockSpec((out_f, tile_b), lambda i: (0, i)),              # logits tile
            pl.BlockSpec((1, tile_b), lambda i: (0, i)),                  # loss partials
        ),
        compiler_params=pltpu.CompilerParams(
            dimension_semantics=("parallel",)),   # batch tiles independent (v7x: 2 TCs)
    )(x_t, w_flat, b_vec)

    # Tiny epilogue: global mean from masked per-lane partials; 1/N is a
    # compile-time constant, normalization uses the global batch size.
    loss = jnp.sum(colsum) * (1.0 / float(out_f * B))
    logits = jnp.transpose(logits_pad[:, :B])   # back to PyTorch (B, OUT) layout
    return logits, loss


if __name__ == "__main__":
    key = jax.random.PRNGKey(0)
    kx, kw, kb = jax.random.split(key, 3)

    B, IN, OUT = 8, 4, 2
    # Deterministic synthetic inputs / parameters (shapes per nn.Linear(4, 2)).
    x = jax.random.normal(kx, (B, IN), dtype=jnp.float32)
    weight = jax.random.uniform(kw, (OUT, IN), dtype=jnp.float32,
                                minval=-0.5, maxval=0.5)
    bias = jax.random.uniform(kb, (OUT,), dtype=jnp.float32,
                              minval=-0.5, maxval=0.5)

    logits, loss = dummy_model_forward(x, weight, bias)
    jax.block_until_ready((logits, loss))

    # Sanity check against plain-JAX reference.
    ref_logits = x @ weight.T + bias
    ref_loss = ref_logits.mean()
    assert logits.shape == (B, OUT), "logits shape mismatch"
    assert jnp.allclose(logits, ref_logits, atol=1e-5), "logits mismatch"
    assert jnp.allclose(jnp.asarray(loss), ref_loss, atol=1e-5), "loss mismatch"

    print("KERNEL_OK")
</pallas_src>

<mosaic_0001>
module attributes {stable_mosaic.version = 11 : i64} {
  func.func @dummy_model_kernel(%arg0: i32, %arg1: memref<4x128xf32, #tpu.memory_space<vmem>>, %arg2: memref<8xf32, #tpu.memory_space<smem>>, %arg3: memref<2xf32, #tpu.memory_space<smem>>, %arg4: memref<2x128xf32, #tpu.memory_space<vmem>>, %arg5: memref<1x128xf32, #tpu.memory_space<vmem>>) attributes {dimension_semantics = [#tpu.dimension_semantics<parallel>], iteration_bounds = array<i64: 1>, scalar_prefetch = 0 : i64, scratch_operands = 0 : i64, tpu.core_type = #tpu.core_type<tc>, window_params = [{transform_indices = @transform_0, window_bounds = array<i64: 4, 128>}, {transform_indices = @transform_1, window_bounds = array<i64: 8>}, {transform_indices = @transform_2, window_bounds = array<i64: 2>}, {transform_indices = @transform_3, window_bounds = array<i64: 2, 128>}, {transform_indices = @transform_4, window_bounds = array<i64: 1, 128>}]} {
    %cst = arith.constant 0.000000e+00 : f32
    %0 = vector.broadcast %cst : f32 to vector<1x128xf32>
    %c0 = arith.constant 0 : index
    %c0_0 = arith.constant 0 : index
    %1 = vector.load %arg1[%c0, %c0_0] : memref<4x128xf32, #tpu.memory_space<vmem>>, vector<1x128xf32>
    %c0_1 = arith.constant 0 : index
    %2 = memref.load %arg2[%c0_1] : memref<8xf32, #tpu.memory_space<smem>>
    %3 = vector.broadcast %2 : f32 to vector<1x128xf32>
    %4 = arith.mulf %1, %3 : vector<1x128xf32>
    %c1 = arith.constant 1 : index
    %c0_2 = arith.constant 0 : index
    %5 = vector.load %arg1[%c1, %c0_2] : memref<4x128xf32, #tpu.memory_space<vmem>>, vector<1x128xf32>
    %c1_3 = arith.constant 1 : index
    %6 = memref.load %arg2[%c1_3] : memref<8xf32, #tpu.memory_space<smem>>
    %7 = vector.broadcast %6 : f32 to vector<1x128xf32>
    %8 = arith.mulf %5, %7 : vector<1x128xf32>
    %9 = arith.addf %4, %8 : vector<1x128xf32>
    %c2 = arith.constant 2 : index
    %c0_4 = arith.constant 0 : index
    %10 = vector.load %arg1[%c2, %c0_4] : memref<4x128xf32, #tpu.memory_space<vmem>>, vector<1x128xf32>
    %c2_5 = arith.constant 2 : index
    %11 = memref.load %arg2[%c2_5] : memref<8xf32, #tpu.memory_space<smem>>
    %12 = vector.broadcast %11 : f32 to vector<1x128xf32>
    %13 = arith.mulf %10, %12 : vector<1x128xf32>
    %14 = arith.addf %9, %13 : vector<1x128xf32>
    %c3 = arith.constant 3 : index
    %c0_6 = arith.constant 0 : index
    %15 = vector.load %arg1[%c3, %c0_6] : memref<4x128xf32, #tpu.memory_space<vmem>>, vector<1x128xf32>
    %c3_7 = arith.constant 3 : index
    %16 = memref.load %arg2[%c3_7] : memref<8xf32, #tpu.memory_space<smem>>
    %17 = vector.broadcast %16 : f32 to vector<1x128xf32>
    %18 = arith.mulf %15, %17 : vector<1x128xf32>
    %19 = arith.addf %14, %18 : vector<1x128xf32>
    %c0_8 = arith.constant 0 : index
    %20 = memref.load %arg3[%c0_8] : memref<2xf32, #tpu.memory_space<smem>>
    %21 = vector.broadcast %20 : f32 to vector<1x128xf32>
    %22 = arith.addf %19, %21 : vector<1x128xf32>
    %c0_9 = arith.constant 0 : index
    %c0_10 = arith.constant 0 : index
    %23 = vector.load %arg4[%c0_9, %c0_10] : memref<2x128xf32, #tpu.memory_space<vmem>>, vector<1x128xf32>
    tpu.vector_store %arg4[%c0_9, %c0_10], %22 {strides = array<i32>} : memref<2x128xf32, #tpu.memory_space<vmem>>, vector<1x128xf32>,
    %24 = arith.addf %0, %22 : vector<1x128xf32>
    %c0_11 = arith.constant 0 : index
    %c0_12 = arith.constant 0 : index
    %25 = vector.load %arg1[%c0_11, %c0_12] : memref<4x128xf32, #tpu.memory_space<vmem>>, vector<1x128xf32>
    %c4 = arith.constant 4 : index
    %26 = memref.load %arg2[%c4] : memref<8xf32, #tpu.memory_space<smem>>
    %27 = vector.broadcast %26 : f32 to vector<1x128xf32>
    %28 = arith.mulf %25, %27 : vector<1x128xf32>
    %c1_13 = arith.constant 1 : index
    %c0_14 = arith.constant 0 : index
    %29 = vector.load %arg1[%c1_13, %c0_14] : memref<4x128xf32, #tpu.memory_space<vmem>>, vector<1x128xf32>
    %c5 = arith.constant 5 : index
    %30 = memref.load %arg2[%c5] : memref<8xf32, #tpu.memory_space<smem>>
    %31 = vector.broadcast %30 : f32 to vector<1x128xf32>
    %32 = arith.mulf %29, %31 : vector<1x128xf32>
    %33 = arith.addf %28, %32 : vector<1x128xf32>
    %c2_15 = arith.constant 2 : index
    %c0_16 = arith.constant 0 : index
    %34 = vector.load %arg1[%c2_15, %c0_16] : memref<4x128xf32, #tpu.memory_space<vmem>>, vector<1x128xf32>
    %c6 = arith.constant 6 : index
    %35 = memref.load %arg2[%c6] : memref<8xf32, #tpu.memory_space<smem>>
    %36 = vector.broadcast %35 : f32 to vector<1x128xf32>
    %37 = arith.mulf %34, %36 : vector<1x128xf32>
    %38 = arith.addf %33, %37 : vector<1x128xf32>
    %c3_17 = arith.constant 3 : index
    %c0_18 = arith.constant 0 : index
    %39 = vector.load %arg1[%c3_17, %c0_18] : memref<4x128xf32, #tpu.memory_space<vmem>>, vector<1x128xf32>
    %c7 = arith.constant 7 : index
    %40 = memref.load %arg2[%c7] : memref<8xf32, #tpu.memory_space<smem>>
    %41 = vector.broadcast %40 : f32 to vector<1x128xf32>
    %42 = arith.mulf %39, %41 : vector<1x128xf32>
    %43 = arith.addf %38, %42 : vector<1x128xf32>
    %c1_19 = arith.constant 1 : index
    %44 = memref.load %arg3[%c1_19] : memref<2xf32, #tpu.memory_space<smem>>
    %45 = vector.broadcast %44 : f32 to vector<1x128xf32>
    %46 = arith.addf %43, %45 : vector<1x128xf32>
    %c1_20 = arith.constant 1 : index
    %c0_21 = arith.constant 0 : index
    %47 = vector.load %arg4[%c1_20, %c0_21] : memref<2x128xf32, #tpu.memory_space<vmem>>, vector<1x128xf32>
    tpu.vector_store %arg4[%c1_20, %c0_21], %46 {strides = array<i32>} : memref<2x128xf32, #tpu.memory_space<vmem>>, vector<1x128xf32>,
    %48 = arith.addf %24, %46 : vector<1x128xf32>
    %c128_i32 = arith.constant 128 : i32
    %49 = arith.muli %arg0, %c128_i32 : i32
    %50 = tpu.iota {dimensions = array<i32: 1>} : vector<1x128xi32>
    %51 = vector.broadcast %49 : i32 to vector<1x128xi32>
    %52 = arith.addi %51, %50 : vector<1x128xi32>
    %c8_i32 = arith.constant 8 : i32
    %53 = vector.broadcast %c8_i32 : i32 to vector<1x128xi32>
    %54 = arith.cmpi slt, %52, %53 : vector<1x128xi32>
    %cst_22 = arith.constant 0.000000e+00 : f32
    %55 = vector.broadcast %cst_22 : f32 to vector<1x128xf32>
    %56 = arith.select %54, %48, %55 : vector<1x128xi1>, vector<1x128xf32>
    %c0_23 = arith.constant 0 : index
    %c0_24 = arith.constant 0 : index
    %57 = vector.load %arg5[%c0_23, %c0_24] : memref<1x128xf32, #tpu.memory_space<vmem>>, vector<1x128xf32>
    tpu.vector_store %arg5[%c0_23, %c0_24], %56 {strides = array<i32>} : memref<1x128xf32, #tpu.memory_space<vmem>>, vector<1x128xf32>,
    return
  }
  func.func @transform_0(%arg0: i32) -> (i32, i32) {
    %c0_i32 = arith.constant 0 : i32
    %c0_i32_0 = arith.constant 0 : i32
    return %c0_i32, %arg0 : i32, i32
  }
  func.func @transform_1(%arg0: i32) -> i32 {
    %c0_i32 = arith.constant 0 : i32
    %c0_i32_0 = arith.constant 0 : i32
    return %c0_i32 : i32
  }
  func.func @transform_2(%arg0: i32) -> i32 {
    %c0_i32 = arith.constant 0 : i32
    %c0_i32_0 = arith.constant 0 : i32
    return %c0_i32 : i32
  }
  func.func @transform_3(%arg0: i32) -> (i32, i32) {
    %c0_i32 = arith.constant 0 : i32
    %c0_i32_0 = arith.constant 0 : i32
    return %c0_i32, %arg0 : i32, i32
  }
  func.func @transform_4(%arg0: i32) -> (i32, i32) {
    %c0_i32 = arith.constant 0 : i32
    %c0_i32_0 = arith.constant 0 : i32
    return %c0_i32, %arg0 : i32, i32
  }
}

</mosaic_0001>

<bundles_post_ra>
// kernel: dummy_model_forward.1
= control target key start
LH: loop header
LB: loop body
LE: loop exit
PB: predicated region body
PF: predicated region fallthrough
CT: control target
= control target key end

     0   :  { %10 = vsyncpa [#allocation3], 0  ;;  %s214_s0 = inlined_call_operand.vmem [shape: f32[4,128], index: 0, kind: input, shape index: {}]   ;;  %s215_s1 = inlined_call_operand.vmem [shape: f32[8], index: 1, kind: input, shape index: {}]   ;;  %s216_s2 = inlined_call_operand.vmem [shape: f32[2], index: 2, kind: input, shape index: {}]   ;;  %s217_s3 = inlined_call_operand.vmem [shape: f32[2,128], index: 3, kind: output, shape index: {0}]   ;;  %s218_s4 = inlined_call_operand.vmem [shape: f32[1,128], index: 4, kind: output, shape index: {1}]  }
   0x1   :  { %s20_s17 = sshll.u32 %s215_s1, 4  ;;  %s21_s17 = int_to_ptr.vmem [resolvable:$true] %s20_s17 }
   0x2   :  { %11 = vsyncpa [#allocation5], 0  ;;  %s30_s20 = sshll.u32 %s216_s2, 4  ;;  %s117_s21 = scalar_lea.vmem %s21_s17, 16  ;;  %s31_s20 = int_to_ptr.vmem [resolvable:$true] %s30_s20 }
   0x3   :  { %p118_p0 = scmp.ne.s32.totalorder %s21_s17, %s117_s21  ;;  %p122_p1 = scmp.lt.s32.totalorder %s21_s17, %s21_s17 }
   0x4   :  { %p123_p2 = scmp.lt.s32.totalorder %s117_s21, %s117_s21 }
   0x6   :  { %p124_p3 = por %p123_p2, %p122_p1 }
   0x8   :  { %p125_p4 = pnand %p124_p3, %p118_p0 }
   0xa   :  { %128 = shalt.err (!%p125_p4)
}
   0xb   :  { %s145_s22 = smov [#allocation2]   ;;  %s129_s23 = scalar_lea.vmem %s31_s20, 16 }
   0xc   :  { %23 = dma.vmem_to_smem %s21_s17, 16, %s145_s22, [#allocation3]  }
   0xd   :  { %p130_p5 = scmp.ne.s32.totalorder %s31_s20, %s129_s23  ;;  %p134_p6 = scmp.lt.s32.totalorder %s31_s20, %s31_s20 }
   0xe   :  { %p135_p7 = scmp.lt.s32.totalorder %s129_s23, %s129_s23 }
  0x10   :  { %p136_p8 = por %p135_p7, %p134_p6 }
  0x12   :  { %p137_p9 = pnand %p136_p8, %p130_p5 }
  0x14   :  { %140 = shalt.err (!%p137_p9)
}
  0x15   :  { %s146_s1 = smov [#allocation4]  }
  0x16   :  { %33 = dma.vmem_to_smem %s31_s20, 16, %s146_s1, [#allocation5]  }
  0x17   :  { %141 = dma.done.wait [#allocation3], 16  }
  0x18   :  { %142 = vsyncadd [#allocation3], 4294967280 }
  0x19   :  { %143 = dma.done.wait [#allocation5], 16  }
  0x1a   :  { %144 = vsyncadd [#allocation5], 4294967280 }
  0x1b   :  { %40 = sfence }
  0x1c   :  { %s42_s2 = sld [smem:[#allocation2]]  ;;  %v41_v0 = vld [vmem:[%s214_s0] sm:$0x1]  ;;  %v45_v1 = vld [vmem:[%s214_s0 + $0x1] sm:$0x1]  ;;  %v90_v27 = vlaneseq }
  0x1d   :  { %s107_s24 = sld [smem:[#allocation2 + $0x1]]  ;;  %v50_v3 = vld [vmem:[%s214_s0 + $0x2] sm:$0x1]  ;;  %v55_v6 = vld [vmem:[%s214_s0 + $0x3] sm:$0x1] }
  0x1e   :  { %s108_s25 = sld [smem:[#allocation2 + $0x2]]  ;;  %v65_v11 = vld [vmem:[%s214_s0] sm:$0x1]  ;;  %v69_v14 = vld [vmem:[%s214_s0 + $0x1] sm:$0x1]  ;;  %v91_v33 = vand.u32 127, %v90_v27 }
  0x1f   :  { %s109_s26 = sld [smem:[#allocation2 + $0x3]]  ;;  %v74_v16 = vld [vmem:[%s214_s0 + $0x2] sm:$0x1]  ;;  %v79_v20 = vld [vmem:[%s214_s0 + $0x3] sm:$0x1] }
  0x20   :  { %s181_s29 = sld [smem:[#allocation4]]  ;;  %vm94_vm0 = vcmp.lt.s32.totalorder %v91_v33, 8 }
  0x21   :  { %s110_s6 = sld [smem:[#allocation2 + $0x4]] }
  0x22   :  { %v43_v2 = vstv %s42_s2  ;;  %s111_s9 = sld [smem:[#allocation2 + $0x5]] }
  0x23   :  { %v44_v4 = vmul.f32 %v43_v2, %v41_v0  ;;  %v47_v5 = vstv %s107_s24  ;;  %s112_s12 = sld [smem:[#allocation2 + $0x6]] }
  0x24   :  { %v48_v7 = vmul.f32 %v47_v5, %v45_v1  ;;  %v52_v8 = vstv %s108_s25  ;;  %s113_s13 = sld [smem:[#allocation2 + $0x7]] }
  0x25   :  { %v53_v9 = vmul.f32 %v52_v8, %v50_v3  ;;  %v57_v10 = vstv %s109_s26  ;;  %s114_s18 = sld [smem:[#allocation4 + $0x1]] }
  0x26   :  { %v49_v12 = vadd.f32 %v48_v7, %v44_v4  ;;  %v58_v13 = vmul.f32 %v57_v10, %v55_v6  ;;  %v61_v21 = vstv %s181_s29 }
  0x27   :  { %v67_v15 = vstv %s110_s6 }
  0x28   :  { %v54_v17 = vadd.f32 %v53_v9, %v49_v12  ;;  %v68_v18 = vmul.f32 %v67_v15, %v65_v11  ;;  %v71_v19 = vstv %s111_s9 }
  0x29   :  { %v72_v22 = vmul.f32 %v71_v19, %v69_v14  ;;  %v76_v23 = vstv %s112_s12 }
  0x2a   :  { %v59_v24 = vadd.f32 %v58_v13, %v54_v17  ;;  %v77_v25 = vmul.f32 %v76_v23, %v74_v16  ;;  %v81_v26 = vstv %s113_s13 }
  0x2b   :  { %v73_v28 = vadd.f32 %v72_v22, %v68_v18  ;;  %v82_v29 = vmul.f32 %v81_v26, %v79_v20  ;;  %v85_v32 = vstv %s114_s18 }
  0x2c   :  { %v62_v30 = vadd.f32 %v61_v21, %v59_v24 }
  0x2d   :  { %v78_v31 = vadd.f32 %v77_v25, %v73_v28 }
  0x2e   :  { %63 = vst [vmem:[%s217_s3] sm:$0x1] %v62_v30 }
  0x2f   :  { %v83_v34 = vadd.f32 %v82_v29, %v78_v31 }
  0x31   :  { %v86_v35 = vadd.f32 %v85_v32, %v83_v34 }
  0x33   :  { %87 = vst [vmem:[%s217_s3 + $0x1] sm:$0x1] %v86_v35  ;;  %v88_v36 = vadd.f32 %v86_v35, %v62_v30 }
  0x35   :  { %v95_v37 = vsel %vm94_vm0, %v88_v36, 0.0 }
  0x36   :  { %96 = vst [vmem:[%s218_s4] sm:$0x1] %v95_v37 }
  0x37   :  { %105 = vsyncpa [#allocation3], 1 }
  0x38   :  { %106 = vsyncpa [#allocation5], 1 }

</bundles_post_ra>
